<compile_context>
chip_gen: v6e
topology: v6e:2x2x1
jax: 0.10.0
libtpu: 0.0.40
codegen_flags: <defaults>
</compile_context>

<pallas_src>
import jax
import jax.numpy as jnp
from jax.experimental import pallas as pl
from jax.experimental.pallas import tpu as pltpu


def _round_up(x, m):
    return ((x + m - 1) // m) * m


def _sublane_multiple(dtype):
    # 8 rows for 4-byte dtypes, 16 for 2-byte, 32 for 1-byte (sublane packing).
    itemsize = jnp.dtype(dtype).itemsize
    return max(8, 32 // max(itemsize, 1))


# ---------------------------------------------------------------------------
# Small-problem fast path: one block, no grid, no scratch, no padding.
# ---------------------------------------------------------------------------
def _linear_small_kernel(x_ref, w_ref, b_ref, o_ref):
    acc = jnp.dot(x_ref[...], w_ref[...], preferred_element_type=jnp.float32)
    acc = acc + b_ref[...].astype(jnp.float32)
    o_ref[...] = acc.astype(o_ref.dtype)


# ---------------------------------------------------------------------------
# Tiled path, float32 output: accumulate directly into the output block
# (VMEM-resident across the k axis), no scratch, no epilogue cast.
# ---------------------------------------------------------------------------
def _linear_kernel_f32(x_ref, w_ref, b_ref, o_ref):
    k = pl.program_id(2)

    @pl.when(k == 0)
    def _init():
        o_ref[...] = jnp.broadcast_to(b_ref[...].astype(jnp.float32), o_ref.shape)

    o_ref[...] += jnp.dot(
        x_ref[...], w_ref[...], preferred_element_type=jnp.float32
    )


# ---------------------------------------------------------------------------
# Tiled path, non-float32 output: f32 VMEM accumulator + cast epilogue.
# ---------------------------------------------------------------------------
def _linear_kernel_acc(x_ref, w_ref, b_ref, o_ref, acc_ref):
    k = pl.program_id(2)

    @pl.when(k == 0)
    def _init():
        acc_ref[...] = jnp.broadcast_to(
            b_ref[...].astype(jnp.float32), acc_ref.shape
        )

    acc_ref[...] += jnp.dot(
        x_ref[...], w_ref[...], preferred_element_type=jnp.float32
    )

    @pl.when(k == pl.num_programs(2) - 1)
    def _finalize():
        o_ref[...] = acc_ref[...].astype(o_ref.dtype)


# Everything below this total-bytes threshold runs the single-block fast path
# (well under the scoped VMEM limit on all of v5e/v6e/v7x, no double-buffering).
_FAST_PATH_BYTES = 4 * 1024 * 1024


def basic_feed_forward(x, w, b, *, tm_max=512, tn_max=512, tk_max=512):
    """y = x @ w + b.

    x: [..., d_in], w: [d_in, d_out], b: [d_out] -> [..., d_out]
    """
    d_in, d_out = w.shape
    orig_shape = x.shape
    x2d = x.reshape(-1, d_in)
    B = x2d.shape[0]
    out_dtype = x.dtype
    b2d = b.reshape(1, d_out)

    itemsize = jnp.dtype(x.dtype).itemsize
    total_bytes = (B * d_in + d_in * d_out + B * d_out + d_out) * itemsize

    # ---------------- fast path: whole problem in one VMEM block --------------
    if total_bytes <= _FAST_PATH_BYTES:
        y = pl.pallas_call(
            _linear_small_kernel,
            out_shape=jax.ShapeDtypeStruct((B, d_out), out_dtype),
        )(x2d, w, b2d)
        return y.reshape(orig_shape[:-1] + (d_out,))

    # ---------------- tiled path ----------------------------------------------
    m_mult = _sublane_multiple(x.dtype)
    if B <= tm_max:
        # Small-batch: one M tile -> weight matrix streamed from HBM exactly once.
        tm = _round_up(B, m_mult)
    else:
        tm = tm_max
    tn = tn_max if d_out >= tn_max else _round_up(d_out, 128)
    tk = tk_max if d_in >= tk_max else _round_up(d_in, 128)

    Mp = _round_up(B, tm)
    Np = _round_up(d_out, tn)
    Kp = _round_up(d_in, tk)

    # Pad only when needed (skip the per-call HBM copies in the aligned case).
    xp = x2d
    if (Mp, Kp) != (B, d_in):
        xp = jnp.zeros((Mp, Kp), x2d.dtype).at[:B, :d_in].set(x2d)
    wp = w
    if (Kp, Np) != (d_in, d_out):
        wp = jnp.zeros((Kp, Np), w.dtype).at[:d_in, :d_out].set(w)
    bp = b2d
    if Np != d_out:
        bp = jnp.zeros((1, Np), b.dtype).at[:, :d_out].set(b2d)

    grid = (Mp // tm, Np // tn, Kp // tk)

    in_specs = [
        pl.BlockSpec((tm, tk), lambda i, j, k: (i, k)),   # x tile
        pl.BlockSpec((tk, tn), lambda i, j, k: (k, j)),   # W tile
        pl.BlockSpec((1, tn), lambda i, j, k: (0, j)),    # bias tile (j-indexed)
    ]
    out_specs = pl.BlockSpec((tm, tn), lambda i, j, k: (i, j))

    if jnp.dtype(out_dtype) == jnp.dtype(jnp.float32):
        kernel = _linear_kernel_f32
        scratch_shapes = []
    else:
        kernel = _linear_kernel_acc
        scratch_shapes = [pltpu.VMEM((tm, tn), jnp.float32)]

    yp = pl.pallas_call(
        kernel,
        out_shape=jax.ShapeDtypeStruct((Mp, Np), out_dtype),
        grid_spec=pltpu.PrefetchScalarGridSpec(
            num_scalar_prefetch=0,
            grid=grid,
            in_specs=in_specs,
            out_specs=out_specs,
            scratch_shapes=scratch_shapes,
        ),
        compiler_params=pltpu.CompilerParams(
            dimension_semantics=("parallel", "parallel", "arbitrary"),
        ),
    )(xp, wp, bp)

    y = yp
    if (Mp, Np) != (B, d_out):
        y = yp[:B, :d_out]
    return y.reshape(orig_shape[:-1] + (d_out,))


if __name__ == "__main__":
    key = jax.random.PRNGKey(0)

    # ---- small shapes consistent with the module (fast path): 8 x 32 -> 16 ----
    B, d_in, d_out = 8, 32, 16
    kx, kw, kb, key = jax.random.split(key, 4)
    bound = 1.0 / (d_in ** 0.5)
    x = jax.random.normal(kx, (B, d_in), dtype=jnp.float32)
    w = jax.random.uniform(kw, (d_in, d_out), dtype=jnp.float32,
                           minval=-bound, maxval=bound)
    b = jax.random.uniform(kb, (d_out,), dtype=jnp.float32,
                           minval=-bound, maxval=bound)

    y = basic_feed_forward(x, w, b)
    jax.block_until_ready(y)
    y_ref = x @ w + b
    assert y.shape == (B, d_out)
    assert jnp.allclose(y, y_ref, atol=1e-5, rtol=1e-5), "small-path mismatch"

    # ---- medium shapes to exercise the tiled path: 512 x 2048 -> 1024 ----
    B2, d_in2, d_out2 = 512, 2048, 1024
    kx2, kw2, kb2, key = jax.random.split(key, 4)
    bound2 = 1.0 / (d_in2 ** 0.5)
    x2 = jax.random.normal(kx2, (B2, d_in2), dtype=jnp.float32)
    w2 = jax.random.uniform(kw2, (d_in2, d_out2), dtype=jnp.float32,
                            minval=-bound2, maxval=bound2)
    b2 = jax.random.uniform(kb2, (d_out2,), dtype=jnp.float32,
                            minval=-bound2, maxval=bound2)

    y2 = basic_feed_forward(x2, w2, b2)
    jax.block_until_ready(y2)
    y2_ref = x2 @ w2 + b2
    assert y2.shape == (B2, d_out2)
    assert jnp.allclose(y2, y2_ref, atol=1e-4, rtol=1e-4), "tiled-path mismatch"

    print("KERNEL_OK")
</pallas_src>

<mosaic_0001>
module attributes {stable_mosaic.version = 11 : i64} {
  func.func @_linear_small_kernel(%arg0: memref<8x32xf32, #tpu.memory_space<vmem>>, %arg1: memref<32x16xf32, #tpu.memory_space<vmem>>, %arg2: memref<1x16xf32, #tpu.memory_space<vmem>>, %arg3: memref<8x16xf32, #tpu.memory_space<vmem>>) attributes {dimension_semantics = [], scalar_prefetch = 0 : i64, scratch_operands = 0 : i64, tpu.core_type = #tpu.core_type<tc>} {
    %c0 = arith.constant 0 : index
    %c0_0 = arith.constant 0 : index
    %0 = vector.load %arg0[%c0, %c0_0] : memref<8x32xf32, #tpu.memory_space<vmem>>, vector<8x32xf32>
    %c0_1 = arith.constant 0 : index
    %c0_2 = arith.constant 0 : index
    %1 = vector.load %arg1[%c0_1, %c0_2] : memref<32x16xf32, #tpu.memory_space<vmem>>, vector<32x16xf32>
    %cst = arith.constant dense<0.000000e+00> : vector<8x16xf32>
    %2 = tpu.matmul %0, %1, %cst {dimension_numbers = #tpu.dot_dimension_numbers<[1], [0], [0], [1], [0, 0, 1, 1], [], []>} : vector<8x32xf32>, vector<32x16xf32>, vector<8x16xf32> -> vector<8x16xf32>
    %c0_3 = arith.constant 0 : index
    %c0_4 = arith.constant 0 : index
    %3 = vector.load %arg2[%c0_3, %c0_4] : memref<1x16xf32, #tpu.memory_space<vmem>>, vector<1x16xf32>
    %4 = vector.broadcast %3 : vector<1x16xf32> to vector<8x16xf32>
    %5 = arith.addf %2, %4 : vector<8x16xf32>
    %c0_5 = arith.constant 0 : index
    %c0_6 = arith.constant 0 : index
    %6 = vector.load %arg3[%c0_5, %c0_6] : memref<8x16xf32, #tpu.memory_space<vmem>>, vector<8x16xf32>
    tpu.vector_store %arg3[%c0_5, %c0_6], %5 {strides = array<i32>} : memref<8x16xf32, #tpu.memory_space<vmem>>, vector<8x16xf32>,
    return
  }
}

</mosaic_0001>

<bundles_post_ra>
// kernel: tpu_custom_call.1
= control target key start
LH: loop header
LB: loop body
LE: loop exit
PB: predicated region body
PF: predicated region fallthrough
CT: control target
= control target key end

     0   :  { %v160_v1 = vmov 0.0   ;;  %vm161_vm0 = vmmov 0   ;;  %s204_s0 = inlined_call_operand.vmem [shape: f32[8,32], index: 0, kind: input, shape index: {}]   ;;  %s205_s1 = inlined_call_operand.vmem [shape: f32[32,16], index: 1, kind: input, shape index: {}]   ;;  %s206_s2 = inlined_call_operand.vmem [shape: f32[1,16], index: 2, kind: input, shape index: {}]   ;;  %s207_s3 = inlined_call_operand.hbm [shape: f32[8,16], index: 3, kind: output, shape index: {}]  }
   0x1   :  { %v19_v0 = vld [vmem:[%s205_s1 + $0x18] sm:$0xff]  ;;  %124 = vmatprep.subr.mxu0 %v160_v1  ;;  %v18_v2 = vld [vmem:[%s205_s1 + $0x10] sm:$0xff]  ;;  %132 = vmatprep.mubr.msk.f32.mxu0 %vm161_vm0, %v160_v1 }
   0x2   :  { %125 = vmatpush3.msra.mxu0 %v19_v0 }
   0x3   :  { %8 = vsyncpa [#allocation3], 0  ;;  %126 = vmatprep.subr.mxu0 %v160_v1  ;;  %v17_v3 = vld [vmem:[%s205_s1 + $0x8] sm:$0xff]  ;;  %v16_v4 = vld [vmem:[%s205_s1] sm:$0xff]  ;;  %vm27_vm1 = vcmask 261120   ;;  %s162_s24 = smov [#allocation2]  }
   0x4   :  { %127 = vmatpush3.msra.mxu0 %v18_v2  ;;  %v15_v5 = vld [vmem:[%s204_s0] sm:$0xff]  ;;  %s109_s25 = sshll.u32 %s162_s24, 4  ;;  %vm101_vm2 = vcmask 130048   ;;  %s110_s25 = int_to_ptr.vmem [resolvable:$true] %s109_s25 }
   0x5   :  { %128 = vmatprep.subr.mxu0 %v160_v1  ;;  %v117_v6 = vld [vmem:[%s206_s2] ss:$0 sm:$0xff]  ;;  %s138_s1 = scalar_lea.vmem %s110_s25, 128  ;;  %p143_p1 = scmp.lt.s32.totalorder %s110_s25, %s110_s25 }
   0x6   :  { %129 = vmatpush3.msra.mxu0 %v17_v3  ;;  %p139_p0 = scmp.ne.s32.totalorder %s110_s25, %s138_s1  ;;  %p144_p2 = scmp.lt.s32.totalorder %s138_s1, %s138_s1 }
   0x7   :  { %130 = vmatprep.subr.mxu0 %v160_v1 }
   0x8   :  { %131 = vmatpush3.msra.mxu0 %v16_v4  ;;  %p145_p3 = por %p144_p2, %p143_p1 }
   0x9   :  { %133 = vmatmul.mubr.msk.f32.vlgmr.msra.gmra.mxu0 %vm27_vm1, %v15_v5 }
   0xa   :  { %p146_p4 = pnand %p145_p3, %p139_p0 }
  0xc9   :  { %v97_v7 = vpop.f32.mrf.mxu0 }
  0xca   :  { %v98_v8 = vadd.f32 %v117_v6, %v97_v7 }
  0xcb   :  { %v134_v9 = vpop.f32.mrf.mxu0 }
  0xcc   :  { %102 = vst.msk [vmem:[#allocation2] sm:$0xff] %vm101_vm2, %v98_v8 }
  0xcd   :  { %149 = shalt.err (!%p146_p4)
}
  0xce   :  { %112 = dma.vmem_to_hbm [thread:$0]  %s110_s25, 128, %s207_s3, [#allocation3]  }
  0xcf   :  { %158 = dma.done.wait [#allocation3], 128  }
  0xd0   :  { %159 = vsyncadd [#allocation3], 4294967168 }
  0xd1   :  { %116 = vsyncpa [#allocation3], 1 }

</bundles_post_ra>
